<compile_context>
chip_gen: v6e
topology: v6e:2x2x1
jax: 0.10.0
libtpu: 0.0.40
codegen_flags: <defaults>
</compile_context>

<pallas_src>
import functools

import jax
import jax.numpy as jnp
from jax import lax
from jax.experimental import pallas as pl
from jax.experimental.pallas import tpu as pltpu


def _round_up(x, m):
    return ((x + m - 1) // m) * m


def _dsconv_kernel(xa_ref, xb_ref, wf_ref, o_ref, *,
                   W, KH, KW, pad, halo, tile_l, num_l_tiles):
    """One (batch, spatial-tile) grid step of the fused depthwise-separable conv.

    xa_ref: (1, Cin_pad, tile_l)   main input block, padded-flat coords [t*tile_l, (t+1)*tile_l)
    xb_ref: (1, Cin_pad, hb)       right-halo block (first hb lanes of the next tile)
    wf_ref: (Cout, KH*KW*Cin_pad)  fused depthwise*pointwise weights, lane-dense 2-D
    o_ref : (1, Cout, tile_l)      lane-dense output tile
    """
    # Contiguous superset window covering every tap of this tile; loaded once,
    # then sliced statically (shift work lands on the otherwise-idle XLU slot).
    win = jnp.concatenate([xa_ref[0], xb_ref[0]], axis=-1)      # (Cin_pad, tile_l + hb)

    # Column masks, one per nonzero dc, computed once and reused across kh.
    # (The P*W+P flat halo already zeroes out-of-row taps -> no row predicates.)
    if num_l_tiles == 1:
        base = 0                                                # fully static path
    else:
        base = pl.program_id(1) * tile_l
    col = (base + lax.broadcasted_iota(jnp.int32, (1, tile_l), 1)) % W
    col_mask = {}
    for dc in range(-pad, pad + 1):
        if dc != 0:
            col_mask[dc] = ((col + dc >= 0) & (col + dc < W)).astype(win.dtype)

    # Pack all KH*KW taps into one (KH*KW*Cin_pad, tile_l) operand; boundary
    # masking is applied to the affected rows while packing.
    patches = []
    for kh in range(KH):                                        # static -> unrolled
        for kw in range(KW):
            off = (kh - pad) * W + (kw - pad)                   # flat-index shift of this tap
            p = lax.slice_in_dim(win, halo + off, halo + off + tile_l, axis=1)
            dc = kw - pad
            if dc != 0:
                p = p * col_mask[dc]
            patches.append(p)
    im2col = jnp.concatenate(patches, axis=0)                   # (KH*KW*Cin_pad, tile_l)

    # Single MXU matmul per tile, f32 accumulation; lane-dense unmasked stores.
    acc = jnp.dot(wf_ref[...], im2col, preferred_element_type=jnp.float32)
    o_ref[0] = acc.astype(o_ref.dtype)                          # (Cout, tile_l)


def depthwise_separable_conv2d(x, dw_weight, pw_weight, padding=1):
    """
    x        : (N, Cin, H, W)      NCHW, as in PyTorch
    dw_weight: (Cin, 1, KH, KW)    torch depthwise Conv2d weight layout
    pw_weight: (Cout, Cin, 1, 1)   torch pointwise Conv2d weight layout
    returns  : (N, Cout, H, W)
    """
    N, Cin, H, W = x.shape
    KH, KW = dw_weight.shape[2], dw_weight.shape[3]
    Cout = pw_weight.shape[0]
    P = padding
    if KH != 2 * P + 1 or KW != 2 * P + 1:
        raise NotImplementedError("kernel assumes a 'same' conv: kernel_size == 2*padding+1")

    L = H * W
    halo = P * W + P                         # max |flat-index shift| over all taps
    itemsize = jnp.dtype(x.dtype).itemsize

    # Sublane-align channels (zero channels x zero weight columns -> no numerical effect).
    Cin_pad = _round_up(Cin, 8)
    K = KH * KW * Cin_pad

    # Right-halo block: multiple of 128 lanes, >= 2*halo; tile_l must be a multiple of hb
    # so the halo block's element offset (t+1)*tile_l is a whole block index.
    hb = _round_up(max(2 * halo, 128), 128)

    # Largest lane tile whose per-step footprint (double-buffered blocks + packed operand)
    # fits a conservative budget valid across v5e/v6e/v7x; explicit vmem_limit below.
    budget = 10 * 1024 * 1024

    def vmem_est(t):
        return (2 * Cin_pad * (t + hb)       # input blocks (x2 pipeline buffers)
                + 2 * Cout * t               # output block (x2)
                + 2 * Cout * K               # weights (x2)
                + (K + Cin_pad) * t          # packed operand + window temporaries
                ) * itemsize

    target = 4096
    while target > 128 and vmem_est(target) > budget:
        target //= 2
    tile_l = min(_round_up(max(target, hb), hb), _round_up(L, hb))
    num_l_tiles = -(-L // tile_l)

    # v7x megacore: keep both TensorCores busy even when N * num_tiles would be 1.
    if N * num_l_tiles == 1 and tile_l >= 2 * hb:
        tile_l = _round_up(tile_l // 2, hb)
        num_l_tiles = -(-L // tile_l)

    L_pad = num_l_tiles * tile_l

    # Fuse depthwise into pointwise in float32 (single rounding), lay out lane-dense 2-D:
    # wf2d[co, (kh*KW + kw)*Cin_pad + ci] = pw[co, ci] * dw[ci, kh, kw].
    dw = dw_weight[:, 0, :, :].astype(jnp.float32)               # (Cin, KH, KW)
    pw = pw_weight[:, :, 0, 0].astype(jnp.float32)               # (Cout, Cin)
    wf4 = pw[:, None, None, :] * jnp.transpose(dw, (1, 2, 0))[None]   # (Cout, KH, KW, Cin)
    wf4 = jnp.pad(wf4, ((0, 0), (0, 0), (0, 0), (0, Cin_pad - Cin)))
    wf2d = wf4.reshape(Cout, K).astype(x.dtype)

    # Flatten spatial (contiguous, free), pad channels to Cin_pad and add the flat halo.
    # Total flat length (num_tiles + 1) * tile_l so both block specs tile it exactly and
    # every tap of every tile (including the padded tail) stays in bounds reading zeros.
    total = (num_l_tiles + 1) * tile_l
    x_flat = jnp.pad(x.reshape(N, Cin, L),
                     ((0, 0), (0, Cin_pad - Cin), (halo, total - halo - L)))

    kernel = functools.partial(
        _dsconv_kernel, W=W, KH=KH, KW=KW, pad=P, halo=halo,
        tile_l=tile_l, num_l_tiles=num_l_tiles)

    hb_per_tile = tile_l // hb
    out_flat = pl.pallas_call(
        kernel,
        out_shape=jax.ShapeDtypeStruct((N, Cout, L_pad), x.dtype),
        grid_spec=pltpu.PrefetchScalarGridSpec(
            num_scalar_prefetch=0,
            grid=(N, num_l_tiles),
            in_specs=[
                # Main tile of the flattened, halo-padded input.
                pl.BlockSpec((1, Cin_pad, tile_l), lambda b, t: (b, 0, t)),
                # Small right-halo block (same array, next hb lanes).
                pl.BlockSpec((1, Cin_pad, hb),
                             lambda b, t: (b, 0, (t + 1) * hb_per_tile)),
                # Fused weights, whole array every step.
                pl.BlockSpec((Cout, K), lambda b, t: (0, 0)),
            ],
            out_specs=pl.BlockSpec((1, Cout, tile_l), lambda b, t: (b, 0, t)),
        ),
        compiler_params=pltpu.CompilerParams(
            dimension_semantics=("parallel", "parallel"),
            vmem_limit_bytes=32 * 1024 * 1024),
    )(x_flat, x_flat, wf2d)

    if L_pad != L:
        out_flat = out_flat[:, :, :L]
    # Contiguous (free when L_pad == L) reshape back to NCHW -- no transposes anywhere.
    return out_flat.reshape(N, Cout, H, W)


def _reference(x, dw_weight, pw_weight, padding=1):
    """Pure-JAX reference matching torch depthwise+pointwise conv semantics."""
    Cin = x.shape[1]
    y = lax.conv_general_dilated(
        x, dw_weight, window_strides=(1, 1),
        padding=((padding, padding), (padding, padding)),
        dimension_numbers=("NCHW", "OIHW", "NCHW"),
        feature_group_count=Cin)
    y = lax.conv_general_dilated(
        y, pw_weight, window_strides=(1, 1), padding=((0, 0), (0, 0)),
        dimension_numbers=("NCHW", "OIHW", "NCHW"))
    return y


if __name__ == "__main__":
    # Module config: in_channels=4, out_channels=8, kernel_size=(3,3), padding=1, bias=False
    N, Cin, Cout, H, W = 2, 4, 8, 16, 16
    KH, KW = 3, 3

    key = jax.random.PRNGKey(0)
    kx, kdw, kpw = jax.random.split(key, 3)

    x = jax.random.normal(kx, (N, Cin, H, W), dtype=jnp.float32)
    dw_weight = jax.random.normal(kdw, (Cin, 1, KH, KW), dtype=jnp.float32) * 0.2
    pw_weight = jax.random.normal(kpw, (Cout, Cin, 1, 1), dtype=jnp.float32) * 0.2

    out = depthwise_separable_conv2d(x, dw_weight, pw_weight, padding=1)
    out = jax.block_until_ready(out)

    ref = _reference(x, dw_weight, pw_weight, padding=1)
    assert out.shape == (N, Cout, H, W), out.shape
    assert jnp.allclose(out, ref, atol=1e-3, rtol=1e-3), "mismatch vs reference conv"

    print("KERNEL_OK")
</pallas_src>

<mosaic_0001>
module attributes {stable_mosaic.version = 11 : i64} {
  func.func @_dsconv_kernel(%arg0: i32, %arg1: i32, %arg2: memref<1x8x256xf32, #tpu.memory_space<vmem>>, %arg3: memref<1x8x128xf32, #tpu.memory_space<vmem>>, %arg4: memref<8x72xf32, #tpu.memory_space<vmem>>, %arg5: memref<1x8x256xf32, #tpu.memory_space<vmem>>) attributes {dimension_semantics = [#tpu.dimension_semantics<parallel>, #tpu.dimension_semantics<parallel>], iteration_bounds = array<i64: 2, 1>, scalar_prefetch = 0 : i64, scratch_operands = 0 : i64, tpu.core_type = #tpu.core_type<tc>, window_params = [{transform_indices = @transform_0, window_bounds = array<i64: 1, 8, 256>}, {transform_indices = @transform_1, window_bounds = array<i64: 1, 8, 128>}, {pipeline_mode = #tpu.pipeline_mode<synchronous>, transform_indices = @transform_2, window_bounds = array<i64: 8, 72>}, {transform_indices = @transform_3, window_bounds = array<i64: 1, 8, 256>}]} {
    %c0 = arith.constant 0 : index
    %c0_0 = arith.constant 0 : index
    %c0_1 = arith.constant 0 : index
    %0 = vector.load %arg2[%c0, %c0_0, %c0_1] : memref<1x8x256xf32, #tpu.memory_space<vmem>>, vector<1x8x256xf32>
    %1 = vector.shape_cast %0 : vector<1x8x256xf32> to vector<8x256xf32>
    %c0_2 = arith.constant 0 : index
    %c0_3 = arith.constant 0 : index
    %c0_4 = arith.constant 0 : index
    %2 = vector.load %arg3[%c0_2, %c0_3, %c0_4] : memref<1x8x128xf32, #tpu.memory_space<vmem>>, vector<1x8x128xf32>
    %3 = vector.shape_cast %2 : vector<1x8x128xf32> to vector<8x128xf32>
    %4 = tpu.concatenate %1, %3 in 1 : vector<8x256xf32>, vector<8x128xf32> -> vector<8x384xf32>
    %5 = tpu.iota {dimensions = array<i32: 1>} : vector<1x256xi32>
    %c0_i32 = arith.constant 0 : i32
    %6 = vector.broadcast %c0_i32 : i32 to vector<1x256xi32>
    %7 = arith.addi %6, %5 : vector<1x256xi32>
    %c16_i32 = arith.constant 16 : i32
    %c0_i32_5 = arith.constant 0 : i32
    %8 = arith.cmpi eq, %c16_i32, %c0_i32_5 : i32
    %c1_i32 = arith.constant 1 : i32
    %9 = arith.select %8, %c1_i32, %c16_i32 : i32
    %10 = vector.broadcast %9 : i32 to vector<1x256xi32>
    %11 = arith.remsi %7, %10 : vector<1x256xi32>
    %c0_i32_6 = arith.constant 0 : i32
    %12 = vector.broadcast %c0_i32_6 : i32 to vector<1x256xi32>
    %13 = arith.cmpi ne, %11, %12 : vector<1x256xi32>
    %c0_i32_7 = arith.constant 0 : i32
    %14 = vector.broadcast %c0_i32_7 : i32 to vector<1x256xi32>
    %15 = arith.cmpi slt, %11, %14 : vector<1x256xi32>
    %c0_i32_8 = arith.constant 0 : i32
    %16 = arith.cmpi slt, %9, %c0_i32_8 : i32
    %17 = vector.broadcast %16 : i1 to vector<1x256xi1>
    %18 = vector.broadcast %17 : vector<1x256xi1> to vector<1x256xi1>
    %19 = arith.xori %15, %18 : vector<1x256xi1>
    %20 = arith.andi %19, %13 : vector<1x256xi1>
    %21 = vector.broadcast %9 : i32 to vector<1x256xi32>
    %22 = arith.addi %11, %21 : vector<1x256xi32>
    %23 = arith.select %20, %22, %11 : vector<1x256xi1>, vector<1x256xi32>
    %c-1_i32 = arith.constant -1 : i32
    %24 = vector.broadcast %c-1_i32 : i32 to vector<1x256xi32>
    %25 = arith.addi %23, %24 : vector<1x256xi32>
    %c0_i32_9 = arith.constant 0 : i32
    %26 = vector.broadcast %c0_i32_9 : i32 to vector<1x256xi32>
    %27 = arith.cmpi sge, %25, %26 : vector<1x256xi32>
    %c-1_i32_10 = arith.constant -1 : i32
    %28 = vector.broadcast %c-1_i32_10 : i32 to vector<1x256xi32>
    %29 = arith.addi %23, %28 : vector<1x256xi32>
    %c16_i32_11 = arith.constant 16 : i32
    %30 = vector.broadcast %c16_i32_11 : i32 to vector<1x256xi32>
    %31 = arith.cmpi slt, %29, %30 : vector<1x256xi32>
    %32 = arith.andi %27, %31 : vector<1x256xi1>
    %33 = arith.extui %32 : vector<1x256xi1> to vector<1x256xi32>
    %34 = arith.sitofp %33 : vector<1x256xi32> to vector<1x256xf32>
    %c1_i32_12 = arith.constant 1 : i32
    %35 = vector.broadcast %c1_i32_12 : i32 to vector<1x256xi32>
    %36 = arith.addi %23, %35 : vector<1x256xi32>
    %c0_i32_13 = arith.constant 0 : i32
    %37 = vector.broadcast %c0_i32_13 : i32 to vector<1x256xi32>
    %38 = arith.cmpi sge, %36, %37 : vector<1x256xi32>
    %c1_i32_14 = arith.constant 1 : i32
    %39 = vector.broadcast %c1_i32_14 : i32 to vector<1x256xi32>
    %40 = arith.addi %23, %39 : vector<1x256xi32>
    %c16_i32_15 = arith.constant 16 : i32
    %41 = vector.broadcast %c16_i32_15 : i32 to vector<1x256xi32>
    %42 = arith.cmpi slt, %40, %41 : vector<1x256xi32>
    %43 = arith.andi %38, %42 : vector<1x256xi1>
    %44 = arith.extui %43 : vector<1x256xi1> to vector<1x256xi32>
    %45 = arith.sitofp %44 : vector<1x256xi32> to vector<1x256xf32>
    %46 = vector.extract_strided_slice %4 {offsets = [0, 0], sizes = [8, 256], strides = [1, 1]} : vector<8x384xf32> to vector<8x256xf32>
    %47 = vector.broadcast %34 : vector<1x256xf32> to vector<8x256xf32>
    %48 = arith.mulf %46, %47 : vector<8x256xf32>
    %49 = vector.extract_strided_slice %4 {offsets = [0, 1], sizes = [8, 256], strides = [1, 1]} : vector<8x384xf32> to vector<8x256xf32>
    %50 = vector.extract_strided_slice %4 {offsets = [0, 2], sizes = [8, 256], strides = [1, 1]} : vector<8x384xf32> to vector<8x256xf32>
    %51 = vector.broadcast %45 : vector<1x256xf32> to vector<8x256xf32>
    %52 = arith.mulf %50, %51 : vector<8x256xf32>
    %53 = vector.extract_strided_slice %4 {offsets = [0, 16], sizes = [8, 256], strides = [1, 1]} : vector<8x384xf32> to vector<8x256xf32>
    %54 = vector.broadcast %34 : vector<1x256xf32> to vector<8x256xf32>
    %55 = arith.mulf %53, %54 : vector<8x256xf32>
    %56 = vector.extract_strided_slice %4 {offsets = [0, 17], sizes = [8, 256], strides = [1, 1]} : vector<8x384xf32> to vector<8x256xf32>
    %57 = vector.extract_strided_slice %4 {offsets = [0, 18], sizes = [8, 256], strides = [1, 1]} : vector<8x384xf32> to vector<8x256xf32>
    %58 = vector.broadcast %45 : vector<1x256xf32> to vector<8x256xf32>
    %59 = arith.mulf %57, %58 : vector<8x256xf32>
    %60 = vector.extract_strided_slice %4 {offsets = [0, 32], sizes = [8, 256], strides = [1, 1]} : vector<8x384xf32> to vector<8x256xf32>
    %61 = vector.broadcast %34 : vector<1x256xf32> to vector<8x256xf32>
    %62 = arith.mulf %60, %61 : vector<8x256xf32>
    %63 = vector.extract_strided_slice %4 {offsets = [0, 33], sizes = [8, 256], strides = [1, 1]} : vector<8x384xf32> to vector<8x256xf32>
    %64 = vector.extract_strided_slice %4 {offsets = [0, 34], sizes = [8, 256], strides = [1, 1]} : vector<8x384xf32> to vector<8x256xf32>
    %65 = vector.broadcast %45 : vector<1x256xf32> to vector<8x256xf32>
    %66 = arith.mulf %64, %65 : vector<8x256xf32>
    %67 = tpu.concatenate %48, %49, %52, %55, %56, %59, %62, %63, %66 in 0 : vector<8x256xf32>, vector<8x256xf32>, vector<8x256xf32>, vector<8x256xf32>, vector<8x256xf32>, vector<8x256xf32>, vector<8x256xf32>, vector<8x256xf32>, vector<8x256xf32> -> vector<72x256xf32>
    %c0_16 = arith.constant 0 : index
    %c0_17 = arith.constant 0 : index
    %68 = vector.load %arg4[%c0_16, %c0_17] : memref<8x72xf32, #tpu.memory_space<vmem>>, vector<8x72xf32>
    %cst = arith.constant dense<0.000000e+00> : vector<8x256xf32>
    %69 = tpu.matmul %68, %67, %cst {dimension_numbers = #tpu.dot_dimension_numbers<[1], [0], [0], [1], [0, 0, 1, 1], [], []>} : vector<8x72xf32>, vector<72x256xf32>, vector<8x256xf32> -> vector<8x256xf32>
    %c0_18 = arith.constant 0 : index
    %c0_19 = arith.constant 0 : index
    %c0_20 = arith.constant 0 : index
    %70 = vector.load %arg5[%c0_18, %c0_19, %c0_20] : memref<1x8x256xf32, #tpu.memory_space<vmem>>, vector<1x8x256xf32>
    %71 = vector.shape_cast %70 : vector<1x8x256xf32> to vector<8x256xf32>
    %72 = vector.shape_cast %69 : vector<8x256xf32> to vector<1x8x256xf32>
    tpu.vector_store %arg5[%c0_18, %c0_19, %c0_20], %72 {strides = array<i32>} : memref<1x8x256xf32, #tpu.memory_space<vmem>>, vector<1x8x256xf32>,
    return
  }
  func.func @transform_0(%arg0: i32, %arg1: i32) -> (i32, i32, i32) {
    %c0_i32 = arith.constant 0 : i32
    %c0_i32_0 = arith.constant 0 : i32
    return %arg0, %c0_i32, %arg1 : i32, i32, i32
  }
  func.func @transform_1(%arg0: i32, %arg1: i32) -> (i32, i32, i32) {
    %c1_i32 = arith.constant 1 : i32
    %0 = arith.addi %arg1, %c1_i32 : i32
    %c2_i32 = arith.constant 2 : i32
    %1 = arith.muli %0, %c2_i32 : i32
    %c0_i32 = arith.constant 0 : i32
    %c0_i32_0 = arith.constant 0 : i32
    return %arg0, %c0_i32, %1 : i32, i32, i32
  }
  func.func @transform_2(%arg0: i32, %arg1: i32) -> (i32, i32) {
    %c0_i32 = arith.constant 0 : i32
    %c0_i32_0 = arith.constant 0 : i32
    %c0_i32_1 = arith.constant 0 : i32
    return %c0_i32, %c0_i32_0 : i32, i32
  }
  func.func @transform_3(%arg0: i32, %arg1: i32) -> (i32, i32, i32) {
    %c0_i32 = arith.constant 0 : i32
    %c0_i32_0 = arith.constant 0 : i32
    return %arg0, %c0_i32, %arg1 : i32, i32, i32
  }
}

</mosaic_0001>

<bundles_post_ra>
// kernel: tpu_custom_call.1
= control target key start
LH: loop header
LB: loop body
LE: loop exit
PB: predicated region body
PF: predicated region fallthrough
CT: control target
= control target key end

     0   :  { %s1332_s0 = inlined_call_operand.hbm [shape: f32[2,8,512], index: 0, kind: input, shape index: {}]   ;;  %s1333_s1 = inlined_call_operand.hbm [shape: f32[2,8,512], index: 1, kind: input, shape index: {}]   ;;  %s1334_s2 = inlined_call_operand.hbm [shape: f32[8,72], index: 2, kind: input, shape index: {}]   ;;  %s1335_s3 = inlined_call_operand.hbm [shape: f32[2,8,256], index: 3, kind: output, shape index: {}]  }
   0x1   :  { %1339 = sst [smem:[#allocation13_spill]] %s1332_s0 }
   0x2   :  { %1340 = sst [smem:[#allocation14_spill]] %s1333_s1 }
   0x3   :  { %8 = vsyncpa [#allocation3], 0 }
   0x4   :  { %10 = vsyncpa [#allocation3 + $0x1], 0 }
   0x5   :  { %11 = vsyncpa [#allocation6], 0 }
   0x6   :  { %13 = vsyncpa [#allocation6 + $0x1], 0 }
   0x7   :  { %14 = vsyncpa [#allocation4], 0 }
   0x8   :  { %16 = vsyncpa [#allocation4 + $0x1], 0  ;;  %s1066_s12 = smov 0   ;;  %s1068_s13 = smov 0  }
   0x9   :  { %s1070_s14 = smov 0   ;;  %s1072_s15 = smov 0  }
   0xa   :  { %s1074_s16 = smov 0   ;;  %s1076_s17 = smov 0  }
   0xb LB: > { %s1097_s18 = sadd.s32 4294967295, %s1026_s17   ;;  %s710_s19 = sadd.s32 4294967294, %s1026_s17   ;;  %s1026_s17 = sphi %s1076_s17, %s22_s17   ;;  %s1022_s16 = sphi %s1074_s16, %s1360_s16   ;;  %s1018_s15 = sphi %s1072_s15, %s1359_s15   ;;  %s1014_s14 = sphi %s1070_s14, %s1358_s14   ;;  %s1010_s13 = sphi %s1068_s13, %s1357_s13   ;;  %s1006_s12 = sphi %s1066_s12, %s1356_s12  }
   0xc   : > { %p1336_p0 = scmp.ne.s32.totalorder %s1014_s14, %s1010_s13  ;;  %p56_p1 = scmp.ne.s32.totalorder %s1010_s13, %s1006_s12 }
   0xd   : > { %p1338_p2 = scmp.eq.s32.totalorder %s1097_s18, 0  ;;  %p135_p3 = scmp.eq.s32.totalorder %s1097_s18, 1 }
   0xe   : > { %p141_p4 = scmp.eq.s32.totalorder %s710_s19, 1  ;;  %p711_p5 = scmp.ge.s32.totalorder %s1026_s17, 1 }
   0xf   : > { %p1109_p6 = por %p1338_p2, %p56_p1  ;;  %p1116_p7 = por %p135_p3, %p1336_p0 }
  0x10   : > { %p1120_p8 = por %p141_p4, %p56_p1  ;;  %p148_p9 = scmp.lt.s32.totalorder %s1026_s17, 3 }
  0x11   : > { %s1342_s21 = scalar_select %p1116_p7, 1, 0 }
  0x12   : > { %s1343_s22 = scalar_select %p1120_p8, 1, 0 }
  0x13   : > { %p1125_p10 = pnand %p711_p5, %p148_p9  ;;  %s1028_s24 = smov [#allocation7]  }
  0x14   : > { %s161_s25 = sshll.u32 %s1028_s24, 4  ;;  %s43_s26 = sadd.s32 1, %s1014_s14  ;;  %s162_s25 = int_to_ptr.vmem [resolvable:$true] %s161_s25 }
  0x15   : > { %p748_p12 = pneg %p1125_p10  ;;  %s34_s28 = sadd.s32 1, %s1022_s16 }
  0x16   : > { %p1140_p1 = scmp.ge.s32.totalorder %s34_s28, 2  ;;  %p51_p3 = scmp.eq.s32.totalorder %s1026_s17, 0 }
  0x17   : > { %p1135_p13 = pnand %p748_p12, %p1338_p2  ;;  %p764_p4 = scmp.lt.s32.totalorder %s1026_s17, 2 }
  0x18   : > { %s866_s30 = scalar_lea.vmem %s162_s25, 128  ;;  %p874_p8 = scmp.lt.s32.totalorder %s162_s25, %s162_s25 }
  0x19   : > { %p857_p5 = pneg %p1135_p13  ;;  %p867_p9 = scmp.ne.s32.totalorder %s162_s25, %s866_s30 }
  0x1a   : > { %p875_p7 = scmp.lt.s32.totalorder %s866_s30, %s866_s30 }
  0x1b   : > { %p869_p11 = pnand %p867_p9, %p857_p5 }
  0x1c   : > { %p876_p12 = por %p875_p7, %p874_p8 }
  0x1d   : > { %p870_p0 = pneg %p869_p11 }
  0x1f   : > { %p877_p2 = pnand %p876_p12, %p870_p0 }
  0x21   : > { %880 = shalt.err (!%p877_p2)
}
  0x22   : > { %751 = dma.hbm_to_vmem [thread:$0]  (!%p1135_p13), %s1334_s2, 128, %s162_s25, [#allocation6]  }
  0x23   : > { %s1362_s28 = smov (%p1140_p1, %s34_s28), 0  ;;  %p1347_p0 = scmp.ne.s32.totalorder %s1014_s14, %s1010_s13 }
  0x24   : > { %s1163_s6 = sand.u32 1, %s1014_s14   ;;  %s38_s7 = ssub.s32 %s1022_s16, %s1362_s28 }
  0x25   : > { %p52_p2 = por %p51_p3, %p1347_p0  ;;  %p41_p7 = scmp.eq.s32.totalorder %s38_s7, 0 }
  0x26   : > { %s714_s8 = sshll.u32 %s1163_s6, 4  ;;  %s735_s9 = sshll.u32 %s1022_s16, 9 }
  0x27   : > { %s1170_s10 = scalar_select %p41_p7, %s1014_s14, %s43_s26  }
  0x28   : > { %s1348_s0 = sld [smem:[#allocation13_spill]]  ;;  %s176_s25 = scalar_lea.vmem [#allocation2], %s714_s8 }
  0x29   : > { %s186_s27 = sshll.u32 %s176_s25, 4  ;;  %p1177_p8 = pnand %p764_p4, %p52_p2  ;;  %s187_s27 = int_to_ptr.vmem [resolvable:$true] %s186_s27 }
  0x2a   : > { %s193_s30 = sand.u32 1, %s1026_s17   ;;  %s1350_s1 = sld [smem:[#allocation14_spill]] }
  0x2b   : > { %s173_s7 = scalar_lea.sflag [#allocation3], %s1163_s6  ;;  %p883_p11 = pneg %p1177_p8 }
  0x2c   : > { %s894_s11 = scalar_lea.vmem %s187_s27, 256  ;;  %s1029_s8 = smov [#allocation2]  }
  0x2d   : > { %p895_p13 = scmp.ne.s32.totalorder %s187_s27, %s894_s11  ;;  %s899_s19 = sshll.u32 %s1029_s8, 4  ;;  %s900_s19 = int_to_ptr.vmem [resolvable:$false] %s899_s19 }
  0x2e   : > { %s184_s24 = scalar_lea.hbm %s1348_s0, %s735_s9  ;;  %s901_s25 = scalar_lea.vmem %s900_s19, 512 }
  0x2f   : > { %p897_p1 = pnand %p895_p13, %p883_p11  ;;  %p902_p4 = scmp.lt.s32.totalorder %s187_s27, %s900_s19 }
  0x30   : > { %s1185_s26 = scalar_lea.hbm %s1350_s1, %s735_s9  ;;  %p903_p5 = scmp.lt.s32.totalorder %s901_s25, %s894_s11 }
  0x31   : > { %p898_p3 = pneg %p897_p1 }
  0x32   : > { %p904_p9 = por %p903_p5, %p902_p4 }
  0x34   : > { %p905_p12 = pnand %p904_p9, %p898_p3 }
  0x36   : > { %908 = shalt.err (!%p905_p12)
}
  0x37   : > { %755 = dma.hbm_to_vmem [thread:$0]  (!%p1177_p8), %s184_s24, 256, %s187_s27, %s173_s7  }
  0x38   : > { %s717_s9 = sshll.u32 %s1163_s6, 3  ;;  %s632_s4 = scalar_lea.hbm %s1185_s26, 256 }
  0x39   : > { %s197_s5 = scalar_lea.vmem [#allocation5], %s717_s9  ;;  %s194_s1 = scalar_lea.sflag [#allocation6], %s193_s30 }
  0x3a   : > { %s208_s0 = sshll.u32 %s197_s5, 4  ;;  %s1030_s11 = smov [#allocation5]   ;;  %s209_s0 = int_to_ptr.vmem [resolvable:$true] %s208_s0 }
  0x3b   : > { %s922_s8 = scalar_lea.vmem %s209_s0, 128  ;;  %s927_s19 = sshll.u32 %s1030_s11, 4  ;;  %s928_s19 = int_to_ptr.vmem [resolvable:$false] %s927_s19 }
  0x3c   : > { %p923_p0 = scmp.ne.s32.totalorder %s209_s0, %s922_s8  ;;  %s929_s25 = scalar_lea.vmem %s928_s19, 256 }
  0x3d   : > { %p930_p13 = scmp.lt.s32.totalorder %s209_s0, %s928_s19  ;;  %p931_p1 = scmp.lt.s32.totalorder %s929_s25, %s922_s8 }
  0x3e   : > { %p925_p2 = pnand %p923_p0, %p883_p11 }
  0x3f   : > { %p932_p3 = por %p931_p1, %p930_p13 }
  0x40   : > { %p926_p7 = pneg %p925_p2 }
  0x42   : > { %p933_p4 = pnand %p932_p3, %p926_p7 }
  0x44   : > { %936 = shalt.err (!%p933_p4)
}
  0x45   : > { %758 = dma.hbm_to_vmem [thread:$0]  (!%p1177_p8), %s632_s4, 128, %s209_s0, %s194_s1  }
  0x46   : > { %217 = sbr.rel (%p1125_p10) target bundleno = 573 (0x23d), region = 32  ;;  %s1205_s6 = sand.u32 (!%p1125_p10), 1, %s1010_s13  }
  0x47   : > { %s721_s24 = sshll.u32 (!%p1125_p10), %s1205_s6, 4  ;;  %s220_s27 = scalar_lea.sflag (!%p1125_p10), [#allocation3], %s1205_s6 }
  0x48   : > { %s1211_s30 = scalar_lea.vmem (!%p1125_p10), [#allocation2], %s721_s24 }
  0x4b   : > { %989 = dma.done.wait (%p1109_p6), %s220_s27, 256  }
  0x4c   : > { %991 = vsyncadd (%p1109_p6), %s220_s27, 4294967040  ;;  %s228_s0 = sand.u32 1, %s1097_s18   ;;  %s722_s1 = sshll.u32 %s1205_s6, 3 }
  0x4d   : > { %s229_s23 = scalar_lea.sflag [#allocation6], %s228_s0  ;;  %s1219_s29 = scalar_lea.vmem [#allocation5], %s722_s1 }
  0x4e   : > { %993 = dma.done.wait (%p1109_p6), %s229_s23, 128  }
  0x4f   : > { %995 = vsyncadd (%p1109_p6), %s229_s23, 4294967168  ;;  %v271_v0 = vlaneseq  ;;  %p1351_p10 = scmp.eq.s32.totalorder %s1097_s18, 0 }
  0x51   : > { %997 = dma.done.wait (%p1351_p10), [#allocation6], 128   ;;  %p1352_p8 = pmov %p1351_p10 }
  0x52   : > { %v1031_v1 = vmov 0.0   ;;  %v272_v2 = vand.u32 127, %v271_v0  ;;  %s1032_s18 = smov 18   ;;  %s1033_s20 = smov 34   ;;  %v1236_v16 = vld [vmem:[%s1219_s29] sm:$0xff]  ;;  %v1240_v17 = vld [vmem:[%s1211_s30 + $0x8] sm:$0xff] }
  0x53   : > { %999 = vsyncadd (%p1352_p8), [#allocation6], 4294967168  ;;  %563 = vmatprep.mubr.f32.mxu0 %v1031_v1  ;;  %s1034_s26 = smov 16   ;;  %s1035_s7 = smov 32   ;;  %v1245_v18 = vld [vmem:[%s1211_s30] sm:$0xff]  ;;  %vm380_vm4 = vcmask 277504  }
  0x54   : > { %v273_v3 = vadd.s32 128, %v272_v2  ;;  %v278_v4 = vand.u32 15, %v272_v2  ;;  %s1036_s9 = smov 2   ;;  %s1037_s4 = smov 95   ;;  %vm368_vm5 = vcmask 261120   ;;  %vm356_vm6 = vcmask 146432  }
  0x55   : > { %s1038_s5 = smov 111   ;;  %s1039_s8 = smov 94   ;;  %vm344_vm7 = vcmask 130048   ;;  %vm330_vm8 = vcmask 15360   ;;  %vm489_vm9 = vcmask 769024   ;;  %vm475_vm10 = vcmask 777216  }
  0x56   : > { %v285_v5 = vand.u32 15, %v273_v3  ;;  %v310_v6 = vadd.s32 1, %v278_v4  ;;  %v298_v7 = vadd.s32 4294967295, %v278_v4  ;;  %s1040_s11 = smov 110   ;;  %s1041_s19 = smov 96   ;;  %vm464_vm11 = vcmask 785408  }
  0x57   : > { %s1042_s25 = smov 112   ;;  %s1043_s27 = smov 126   ;;  %vm450_vm12 = vcmask 900096   ;;  %vm436_vm13 = vcmask 908288   ;;  %vm425_vm14 = vcmask 916480   ;;  %vm411_vm15 = vcmask 1031168  }
  0x58   : > { %v311_v8 = vadd.s32 1, %v285_v5  ;;  %vm314_vm0 = vcmp.lt.s32.totalorder %v310_v6, 16  ;;  %v299_v9 = vadd.s32 4294967295, %v285_v5  ;;  %vm300_vm1 = vcmp.ge.s32.totalorder %v298_v7, 0  ;;  %s1044_s30 = smov 127   ;;  %s263_s0 = scalar_lea.vmem [#allocation8], %s721_s24 }
  0x59   : > { %v727_v10 = vsel %vm314_vm0, 1.0, %v1031_v1  ;;  %v1229_v12 = vsel %vm300_vm1, 1.0, %v1031_v1  ;;  %vm397_vm0 = vcmask 1039360   ;;  %vm495_vm1 = vcmask 588800   ;;  %s589_s1 = sshll.u32 %s263_s0, 4  ;;  %s737_s23 = sshll.u32 %s1018_s15, 8  ;;  %s1287_s1 = int_to_ptr.vmem [resolvable:$true] %s589_s1 }
  0x5a   : > { %vm315_vm2 = vcmp.lt.s32.totalorder %v311_v8, 16  ;;  %vm301_vm3 = vcmp.ge.s32.totalorder %v299_v9, 0  ;;  %p1353_p11 = scmp.ne.s32.totalorder %s1342_s21, 0  ;;  %s1045_s15 = smov [#allocation8]  }
  0x5b   : > { %v728_v11 = vsel %vm315_vm2, 1.0, %v1031_v1  ;;  %v1231_v13 = vsel %vm301_vm3, 1.0, %v1031_v1  ;;  %s942_s24 = sshll.u32 %s1045_s15, 4  ;;  %s943_s24 = int_to_ptr.vmem [resolvable:$false] %s942_s24 }
  0x5c   : > { %v840_v14 = vpack.i.bf16 %v728_v11, %v727_v10  ;;  %v845_v15 = vpack.i.bf16 %v1231_v13, %v1229_v12  ;;  %p945_p12 = scmp.lt.s32.totalorder %s1287_s1, %s943_s24 }
  0x5e   : > { %841 = vrot.lane.b32.xlu1 %v840_v14, %s1032_s18  ;;  %831 = vrot.lane.b32.xlu0 %v840_v14, %s1033_s20  ;;  %s587_s20 = scalar_lea.hbm %s1335_s3, %s737_s23 }
  0x62   : > { %846 = vrot.lane.b32.xlu1 %v845_v15, %s1034_s26  ;;  %836 = vrot.lane.b32.xlu0 %v845_v15, %s1035_s7  ;;  %s573_s26 = scalar_lea.sflag [#allocation4], %s1205_s6  ;;  %s938_s7 = scalar_lea.vmem %s1287_s1, 256 }
  0x63   : > { %p939_p6 = scmp.ne.s32.totalorder %s1287_s1, %s938_s7 }
  0x65   : > { %p940_p5 = pnand %p939_p6, %p1353_p11 }
  0x66   : > { %851 = vrot.lane.b32.xlu0 %v840_v14, %s1036_s9  ;;  %473 = vrot.lane.b32.xlu1 %v1236_v16, %s1037_s4  ;;  %s944_s9 = scalar_lea.vmem %s943_s24, 512 }
  0x67   : > { %p941_p9 = pneg %p940_p5  ;;  %p946_p0 = scmp.lt.s32.totalorder %s944_s9, %s938_s7 }
  0x69   : > { %p947_p2 = por %p946_p0, %p945_p12 }
  0x6a   : > { %471 = vrot.lane.b32.xlu0 %v1240_v17, %s1037_s4  ;;  %432 = vrot.lane.b32.xlu1 %v1240_v17, %s1038_s5 }
  0x6b   : > { %p948_p7 = pnand %p947_p2, %p941_p9 }
  0x6e   : > { %469 = vrot.lane.b32.xlu0 %v1245_v18, %s1037_s4  ;;  %430 = vrot.lane.b32.xlu1 %v1245_v18, %s1038_s5 }
  0x72   : > { %434 = vrot.lane.b32.xlu0 %v1236_v16, %s1038_s5 }
  0xd0   : > { %v842_v19 = vpop.permute.xlu1 %841  ;;  %v832_v20 = vpop.permute.xlu0 %831 }
  0xd1   : > { %v843_v21 = vunpack.i.l.bf16 %v842_v19  ;;  %v833_v22 = vunpack.i.l.bf16 %v832_v20  ;;  %v844_v29 = vunpack.i.h.bf16 %v842_v19  ;;  %v834_v30 = vunpack.i.h.bf16 %v832_v20 }
  0xd3   : > { %v361_v23 = vmul.f32 %v843_v21, %v1245_v18  ;;  %v385_v24 = vmul.f32 %v833_v22, %v1245_v18  ;;  %v363_v34 = vmul.f32 %v844_v29, %v1236_v16  ;;  %v387_v35 = vmul.f32 %v834_v30, %v1236_v16 }
  0xd4   : > { %v847_v25 = vpop.permute.xlu1 %846  ;;  %v837_v26 = vpop.permute.xlu0 %836  ;;  %v381_v41 = vsel %vm380_vm4, %v833_v22, %v834_v30  ;;  %v357_v45 = vsel %vm356_vm6, %v843_v21, %v844_v29 }
  0xd5   : > { %v848_v27 = vunpack.i.l.bf16 %v847_v25  ;;  %v838_v28 = vunpack.i.l.bf16 %v837_v26  ;;  %483 = vrot.lane.b32.xlu1 %v385_v24, %s1039_s8  ;;  %444 = vrot.lane.b32.xlu0 %v361_v23, %s1040_s11  ;;  %v849_v36 = vunpack.i.h.bf16 %v847_v25  ;;  %v839_v37 = vunpack.i.h.bf16 %v837_v26 }
  0xd6   : > { %v386_v43 = vmul.f32 %v381_v41, %v1240_v17  ;;  %v362_v48 = vmul.f32 %v357_v45, %v1240_v17 }
  0xd7   : > { %v349_v31 = vmul.f32 %v848_v27, %v1245_v18  ;;  %v373_v32 = vmul.f32 %v838_v28, %v1245_v18  ;;  %v351_v39 = vmul.f32 %v849_v36, %v1236_v16  ;;  %v375_v40 = vmul.f32 %v839_v37, %v1236_v16 }
  0xd8   : > { %v852_v33 = vpop.permute.xlu0 %851  ;;  %v369_v44 = vsel %vm368_vm5, %v838_v28, %v839_v37  ;;  %v345_v49 = vsel %vm344_vm7, %v848_v27, %v849_v36  ;;  %v474_v54 = vpop.permute.xlu1 %473  ;;  %v494_v36 = vld [vmem:[#allocation7] sm:$0xff] }
  0xd9   : > { %458 = vrot.lane.b32.xlu1 %v373_v32, %s1041_s19  ;;  %419 = vrot.lane.b32.xlu0 %v349_v31, %s1042_s25  ;;  %v854_v38 = vunpack.i.h.bf16 %v852_v33  ;;  %v853_v46 = vunpack.i.l.bf16 %v852_v33  ;;  %v374_v47 = vmul.f32 %v369_v44, %v1240_v17  ;;  %v350_v51 = vmul.f32 %v345_v49, %v1240_v17 }
  0xda   : > { %v323_v32 = vmul.f32 %v1231_v13, %v1240_v17 }
  0xdb   : > { %v337_v42 = vmul.f32 %v854_v38, %v1236_v16  ;;  %v335_v50 = vmul.f32 %v853_v46, %v1245_v18  ;;  %v331_v52 = vsel %vm330_vm8, %v853_v46, %v854_v38 }
  0xdc   : > { %v336_v53 = vmul.f32 %v331_v52, %v1240_v17  ;;  %v472_v55 = vpop.permute.xlu0 %471  ;;  %v433_v56 = vpop.permute.xlu1 %432 }
  0xdd   : > { %448 = vrot.lane.b32.xlu1 %v363_v34, %s1040_s11  ;;  %487 = vrot.lane.b32.xlu0 %v387_v35, %s1039_s8  ;;  %v477_v8 = vsel %vm475_vm10, %v472_v55, %v474_v54  ;;  %v322_v35 = vmul.f32 %v1229_v12, %v1245_v18 }
  0xe0   : > { %v470_v57 = vpop.permute.xlu0 %469  ;;  %v431_v58 = vpop.permute.xlu1 %430 }
  0xe1   : > { %423 = vrot.lane.b32.xlu1 %v351_v39, %s1042_s25  ;;  %462 = vrot.lane.b32.xlu0 %v375_v40, %s1041_s19  ;;  %v476_v11 = vsel %vm475_vm10, %v470_v57, %v472_v55  ;;  %v437_v23 = vsel %vm436_vm13, %v431_v58, %v433_v56 }
  0xe4   : > { %v435_v59 = vpop.permute.xlu0 %434 }
  0xe5   : > { %485 = vrot.lane.b32.xlu1 %v386_v43, %s1039_s8  ;;  %409 = vrot.lane.b32.xlu0 %v337_v42, %s1043_s27  ;;  %v438_v22 = vsel %vm436_vm13, %v433_v56, %v435_v59 }
  0xe9   : > { %460 = vrot.lane.b32.xlu1 %v374_v47, %s1041_s19  ;;  %446 = vrot.lane.b32.xlu0 %v362_v48, %s1040_s11 }
  0xed   : > { %421 = vrot.lane.b32.xlu0 %v350_v51, %s1042_s25  ;;  %405 = vrot.lane.b32.xlu1 %v335_v50, %s1043_s27 }
  0xf1   : > { %393 = vrot.lane.b32.xlu0 %v1240_v17, %s1044_s30  ;;  %407 = vrot.lane.b32.xlu1 %v336_v53, %s1043_s27 }
  0xf5   : > { %391 = vrot.lane.b32.xlu0 %v1245_v18, %s1044_s30  ;;  %395 = vrot.lane.b32.xlu1 %v1236_v16, %s1044_s30 }
 0x147   : > { %v484_v60 = vpop.permute.xlu1 %483  ;;  %v445_v61 = vpop.permute.xlu0 %444 }
 0x14b   : > { %v459_v62 = vpop.permute.xlu1 %458  ;;  %v420_v63 = vpop.permute.xlu0 %419 }
 0x14f   : > { %v449_v0 = vpop.permute.xlu1 %448  ;;  %v488_v1 = vpop.permute.xlu0 %487 }
 0x153   : > { %v424_v2 = vpop.permute.xlu1 %423  ;;  %v463_v3 = vpop.permute.xlu0 %462 }
 0x157   : > { %v486_v4 = vpop.permute.xlu1 %485  ;;  %v410_v5 = vpop.permute.xlu0 %409 }
 0x158   : > { %v491_v6 = vsel %vm489_vm9, %v486_v4, %v488_v1  ;;  %v490_v7 = vsel %vm489_vm9, %v484_v60, %v486_v4 }
 0x159   : > { %513 = vmatprep.subr.mxu0 %v491_v6 }
 0x15a   : > { %514 = vmatpush1.msra.mxu0 %v490_v7 }
 0x15b   : > { %v461_v9 = vpop.permute.xlu1 %460  ;;  %515 = vmatprep.subr.mxu0 %v477_v8  ;;  %v447_v10 = vpop.permute.xlu0 %446 }
 0x15c   : > { %516 = vmatpush1.msra.mxu0 %v476_v11  ;;  %v466_v14 = vsel %vm464_vm11, %v461_v9, %v463_v3  ;;  %v465_v15 = vsel %vm464_vm11, %v459_v62, %v461_v9  ;;  %v452_v16 = vsel %vm450_vm12, %v447_v10, %v449_v0  ;;  %v451_v21 = vsel %vm450_vm12, %v445_v61, %v447_v10 }
 0x15d   : > { %517 = vmatprep.subr.mxu0 %v466_v14 }
 0x15e   : > { %518 = vmatpush1.msra.mxu0 %v465_v15 }
 0x15f   : > { %519 = vmatprep.subr.mxu0 %v452_v16  ;;  %v422_v19 = vpop.permute.xlu0 %421  ;;  %v406_v20 = vpop.permute.xlu1 %405 }
 0x160   : > { %520 = vmatpush1.msra.mxu0 %v451_v21  ;;  %v427_v24 = vsel %vm425_vm14, %v422_v19, %v424_v2  ;;  %v426_v27 = vsel %vm425_vm14, %v420_v63, %v422_v19 }
 0x161   : > { %521 = vmatprep.subr.mxu0 %v438_v22 }
 0x162   : > { %522 = vmatpush1.msra.mxu0 %v437_v23 }
 0x163   : > { %523 = vmatprep.subr.mxu0 %v427_v24  ;;  %v394_v25 = vpop.permute.xlu0 %393  ;;  %v408_v26 = vpop.permute.xlu1 %407 }
 0x164   : > { %524 = vmatpush1.msra.mxu0 %v426_v27  ;;  %v413_v28 = vsel %vm411_vm15, %v408_v26, %v410_v5  ;;  %v412_v29 = vsel %vm411_vm15, %v406_v20, %v408_v26 }
 0x165   : > { %525 = vmatprep.subr.mxu0 %v413_v28 }
 0x166   : > { %526 = vmatpush1.msra.mxu0 %v412_v29 }
 0x167   : > { %v392_v30 = vpop.permute.xlu0 %391  ;;  %v396_v31 = vpop.permute.xlu1 %395 }
 0x168   : > { %v399_v33 = vsel %vm397_vm0, %v394_v25, %v396_v31  ;;  %v398_v34 = vsel %vm397_vm0, %v392_v30, %v394_v25 }
 0x169   : > { %527 = vmatprep.subr.mxu0 %v399_v33 }
 0x16a   : > { %528 = vmatpush1.msra.mxu0 %v398_v34 }
 0x16b   : > { %529 = vmatprep.subr.mxu0 %v323_v32 }
 0x16c   : > { %530 = vmatpush1.msra.mxu0 %v322_v35 }
 0x16d   : > { %729 = vmatmul.mubr.msk.f32.vlgmr.msra.gmra.mxu0 %vm495_vm1, %v494_v36 }
 0x22d   : > { %v565_v37 = vpop.f32.mrf.mxu0 }
 0x22e   : > { %570 = vst [vmem:[%s263_s0] sm:$0xff] %v565_v37 }
 0x22f   : > { %v567_v12 = vpop.f32.mrf.mxu0 }
 0x230   : > { %571 = vst [vmem:[%s263_s0 + $0x8] sm:$0xff] %v567_v12 }
 0x231   : > { %951 = shalt.err (!%p948_p7)
}
 0x232   : > { %s952_s4 = scalar_lea.hbm %s587_s20, 256  ;;  %s956_s8 = scalar_lea.hbm %s1335_s3, 512 }
 0x233   : > { %p953_p13 = scmp.ne.s32.totalorder %s587_s20, %s952_s4  ;;  %p957_p4 = scmp.lt.s32.totalorder %s587_s20, %s1335_s3 }
 0x234   : > { %p958_p10 = scmp.lt.s32.totalorder %s956_s8, %s952_s4 }
 0x235   : > { %p954_p1 = pnand %p953_p13, %p1353_p11 }
 0x236   : > { %p959_p8 = por %p958_p10, %p957_p4 }
 0x237   : > { %p955_p3 = pneg %p954_p1 }
 0x239   : > { %p960_p6 = pnand %p959_p8, %p955_p3 }
 0x23b   : > { %963 = shalt.err (!%p960_p6)
}
 0x23c   : > { %746 = dma.vmem_to_hbm [thread:$0]  (%p1353_p11), %s1287_s1, 256, %s587_s20, %s573_s26  }
 0x23d PF: > { %s601_s25 = sand.u32 1, %s1006_s12   ;;  %p1354_p5 = scmp.ne.s32.totalorder %s1343_s22, 0 }
 0x23e   : > { %p1355_p9 = scmp.ge.s32.totalorder %s1026_s17, 2  ;;  %s602_s27 = scalar_lea.sflag [#allocation4], %s601_s25 }
 0x240   : > { %p760_p12 = pnand %p1355_p9, %p1354_p5 }
 0x242   : > { %p761_p0 = pneg %p760_p12 }
 0x244   : > { %1001 = dma.done.wait (%p761_p0), %s602_s27, 256  }
 0x245   : > { %1003 = vsyncadd (%p761_p0), %s602_s27, 4294967040  ;;  %s22_s17 = sadd.s32 1, %s1026_s17   ;;  %s1356_s12 = smov %s1010_s13 }
 0x246   : > { %p19_p2 = scmp.ge.s32.totalorder %s22_s17, 4   ;;  %s1357_s13 = smov %s1014_s14 }
 0x247   : > { %s1358_s14 = smov %s1170_s10  ;;  %s1359_s15 = smov %s1022_s16 }
 0x248   : > { %s1360_s16 = smov %s1362_s28  ;;  %21 = sbr.rel (!%p19_p2) target bundleno = 11 (0xb), region = 94 }
 0x24d   :  { %607 = vsyncpa [#allocation3], 1 }
 0x24e   :  { %609 = vsyncpa [#allocation3 + $0x1], 1 }
 0x24f   :  { %610 = vsyncpa [#allocation6], 1 }
 0x250   :  { %612 = vsyncpa [#allocation6 + $0x1], 1 }
 0x251   :  { %613 = vsyncpa [#allocation4], 1 }
 0x252   :  { %615 = vsyncpa [#allocation4 + $0x1], 1 }

</bundles_post_ra>
